<compile_context>
chip_gen: v7x
topology: tpu7x:2x2x1
jax: 0.10.0
libtpu: 0.0.40
codegen_flags: <defaults>
</compile_context>

<pallas_src>
import jax
import jax.numpy as jnp
from jax.experimental import pallas as pl
from jax.experimental.pallas import tpu as pltpu


def _top2gate_stats_kernel(x_ref, wt_ref, noise_ref,
                           inter_ref, cnt1_ref, me_ref,
                           cnt2_ref, tri_ref):
    i = pl.program_id(0)
    TS = x_ref.shape[0]
    E = wt_ref.shape[1]

    @pl.when(i == 0)
    def _init():
        cnt1_ref[...] = jnp.zeros_like(cnt1_ref)
        cnt2_ref[...] = jnp.zeros_like(cnt2_ref)
        me_ref[...] = jnp.zeros_like(me_ref)
        # Hoisted lower-triangular ones matrix (cumsum MXU operand), built once and reused.
        r = jax.lax.broadcasted_iota(jnp.int32, (TS, TS), 0)
        c = jax.lax.broadcasted_iota(jnp.int32, (TS, TS), 1)
        tri_ref[...] = (c <= r).astype(tri_ref.dtype)

    # logits = wg(input): cast the streamed x block to bf16 on the VPU, f32 MXU accumulate.
    logits = jnp.dot(x_ref[...].astype(jnp.bfloat16), wt_ref[...],
                     preferred_element_type=jnp.float32)              # [TS, E]

    # softmax(logits, dim=1)
    lmax = jnp.max(logits, axis=1, keepdims=True)
    ez = jnp.exp(logits - lmax)
    gates = ez / jnp.sum(ez, axis=1, keepdims=True)

    iota_e = jax.lax.broadcasted_iota(jnp.int32, (TS, E), 1)

    # top-1 straight from logits (argmax is softmax-invariant), first-occurrence ties.
    idx1 = jnp.min(jnp.where(logits == lmax, iota_e, E), axis=1, keepdims=True)
    mask1 = iota_e == idx1

    # top-2 on gumbel-noised logits with the top-1 expert masked out.
    logits_ex1 = jnp.where(mask1, -jnp.inf, logits + noise_ref[...])
    max2 = jnp.max(logits_ex1, axis=1, keepdims=True)
    idx2 = jnp.min(jnp.where(logits_ex1 == max2, iota_e, E), axis=1, keepdims=True)
    mask2 = iota_e == idx2

    mask1f = mask1.astype(jnp.float32)
    mask2f = mask2.astype(jnp.float32)

    # Blocked inclusive cumsum over tokens: one [TS,TS]x[TS,2E] MXU matmul.  bf16 0/1
    # operands + f32 accumulation are exact integer counts on every chip generation.
    both = jnp.concatenate([mask1f, mask2f], axis=1).astype(jnp.bfloat16)
    csum = jnp.dot(tri_ref[...], both, preferred_element_type=jnp.float32)   # [TS, 2E]

    cnt1_old = cnt1_ref[...]
    cnt2_old = cnt2_ref[...]
    loc1 = csum[:, :E] - 1.0 + cnt1_old          # global locations1
    loc2p = csum[:, E:] - 1.0 + cnt2_old         # cumsum(mask2)-1 (mask1 total added in emit)

    # Carry: the last row of an inclusive cumsum IS the per-block column total.
    cnt1_ref[...] = cnt1_old + csum[TS - 1:TS, :E]
    cnt2_ref[...] = cnt2_old + csum[TS - 1:TS, E:]
    me_ref[...] = me_ref[...] + jnp.sum(gates, axis=0, keepdims=True)

    # Per-token scalars for the emit call (O(S) HBM, not O(S^2)).
    g1 = jnp.sum(gates * mask1f, axis=1, keepdims=True)
    g2 = jnp.sum(gates * mask2f, axis=1, keepdims=True)
    loc1_s = jnp.sum(loc1 * mask1f, axis=1, keepdims=True)
    loc2p_s = jnp.sum(loc2p * mask2f, axis=1, keepdims=True)
    inter_ref[...] = jnp.concatenate(
        [idx1.astype(jnp.float32), idx2.astype(jnp.float32),
         g1, g2, loc1_s, loc2p_s,
         jnp.zeros((TS, 2), jnp.float32)], axis=1)                    # [TS, 8]


def _top2gate_emit_kernel(inter_ref, cnt1_ref, cw_ref, disp_ref):
    TS = inter_ref.shape[0]
    E = cnt1_ref.shape[1]
    EC = cw_ref.shape[1]
    C = EC // E

    inter = inter_ref[...]
    idx1 = inter[:, 0:1].astype(jnp.int32)
    idx2 = inter[:, 1:2].astype(jnp.int32)
    g1 = inter[:, 2:3]
    g2 = inter[:, 3:4]
    loc1_s = inter[:, 4:5]
    loc2p_s = inter[:, 5:6]

    # locations2 += sum(mask1, dim=0): gather the global mask1 count at idx2.
    iota_e = jax.lax.broadcasted_iota(jnp.int32, (TS, E), 1)
    mask2f = (iota_e == idx2).astype(jnp.float32)
    loc2_s = loc2p_s + jnp.sum(mask2f * cnt1_ref[...], axis=1, keepdims=True)

    # Drop tokens over capacity, then renormalize the two gate values (exact divide,
    # per review: the emit sweep is HBM-write bound, so exactness costs nothing visible).
    capf = jnp.float32(C)
    keep1 = (loc1_s < capf).astype(jnp.float32)
    keep2 = (loc2_s < capf).astype(jnp.float32)
    g1k = g1 * keep1
    g2k = g2 * keep2
    denom = jnp.maximum(g1k + g2k, jnp.finfo(jnp.float32).eps)
    g1n = g1k / denom
    g2n = g2k / denom

    # combine[s,e,c] laid out lane-dense as [TS, E*C]; e/c index math done once on a
    # (1, E*C) row iota and broadcast through the comparisons (no [TS,E*C] div/mod).
    col = jax.lax.broadcasted_iota(jnp.int32, (1, EC), 1)
    e_col = col // C
    c_col = col % C
    sel1 = jnp.logical_and(e_col == idx1, c_col == loc1_s.astype(jnp.int32))
    sel2 = jnp.logical_and(e_col == idx2, c_col == loc2_s.astype(jnp.int32))
    cw = jnp.where(sel1, g1n, 0.0) + jnp.where(sel2, g2n, 0.0)        # [TS, EC] f32
    cw_ref[...] = cw.astype(cw_ref.dtype)
    # dispatch from the select masks (not `cw != 0`) so a bf16 combine output keeps the
    # exact nonzero pattern of the f32 math.
    disp = jnp.logical_or(jnp.logical_and(sel1, g1n > 0.0),
                          jnp.logical_and(sel2, g2n > 0.0))
    disp_ref[...] = disp.astype(jnp.int8)


def top2gate(x, wg_weight, gumbel_noise, *, token_block=None,
             combine_dtype=jnp.bfloat16):
    """GShard Top2Gate forward.

    Returns (l_aux, combine_weights [S,E,C], dispatch_mask [S,E,C] bool).
    combine_dtype defaults to bfloat16 (halves the dominant [S, E*C] HBM writeback);
    pass jnp.float32 for exact dtype parity with the PyTorch reference.
    """
    S, M = x.shape
    E = wg_weight.shape[0]
    assert E >= 2, "top-2 gating needs at least 2 experts"
    assert S % E == 0, "num_tokens must be divisible by num_experts"
    C = 2 * S // E
    EC = E * C

    x = jnp.asarray(x)                              # streamed in native dtype; cast per block
    wt = jnp.asarray(wg_weight, jnp.bfloat16).T     # [M, E] resident bf16 MXU operand
    noise = jnp.asarray(gumbel_noise, jnp.float32)

    # ---- generation-aware block size / VMEM limit --------------------------------------
    try:
        vmem_cap = int(pltpu.get_tpu_info().vmem_capacity_bytes)
    except Exception:
        vmem_cap = 64 * 1024 * 1024                 # conservative (v7x per-TC) fallback
    vmem_limit = min((vmem_cap * 3) // 4, 100 * 1024 * 1024)
    vmem_budget = int(0.6 * vmem_limit)

    x_bytes = jnp.dtype(x.dtype).itemsize
    cw_bytes = jnp.dtype(combine_dtype).itemsize

    def _fits(ts):
        # stats call: double-buffered x/noise/inter blocks, resident wt, [TS,TS] bf16 tri.
        stats = (2 * ts * M * x_bytes + 2 * ts * E * 4 + 2 * M * E * 2
                 + 2 * ts * 128 * 4 + ts * ts * 2 + 4 * ts * 2 * E * 4)
        # emit call: double-buffered inter block in, cw/disp blocks out.
        emit = 2 * ts * 128 * 4 + 2 * ts * EC * (cw_bytes + 1) + 4 * E * 4
        return max(stats, emit) <= vmem_budget

    if token_block is None:
        cands = [c for c in (1024, 512, 256, 128, 64, 32, 16, 8) if c <= S and S % c == 0]
        if S <= 1024 and S not in cands:
            cands.insert(0, S)          # small problems: one block, no pipelining needed
        if not cands:
            cands = [S]
        token_block = cands[-1]
        for cand in cands:              # largest token block that fits the VMEM budget
            if _fits(cand):
                token_block = cand
                break
    TS = token_block
    assert S % TS == 0 and (TS == S or TS % 8 == 0)
    NB = S // TS

    # ---- pass 1: stats sweep (sequential over token blocks: cumsum carry) --------------
    inter, cnt1, me = pl.pallas_call(
        _top2gate_stats_kernel,
        out_shape=(
            jax.ShapeDtypeStruct((S, 8), jnp.float32),    # per-token intermediates
            jax.ShapeDtypeStruct((1, E), jnp.float32),    # total mask1 counts (pre-drop)
            jax.ShapeDtypeStruct((1, E), jnp.float32),    # sum of gates over tokens
        ),
        grid=(NB,),
        in_specs=[
            pl.BlockSpec((TS, M), lambda i: (i, 0)),
            pl.BlockSpec((M, E), lambda i: (0, 0)),
            pl.BlockSpec((TS, E), lambda i: (i, 0)),
        ],
        out_specs=(
            pl.BlockSpec((TS, 8), lambda i: (i, 0)),
            pl.BlockSpec((1, E), lambda i: (0, 0)),
            pl.BlockSpec((1, E), lambda i: (0, 0)),
        ),
        scratch_shapes=[
            pltpu.VMEM((1, E), jnp.float32),        # running mask2 counts (carry)
            pltpu.VMEM((TS, TS), jnp.bfloat16),     # hoisted lower-triangular ones
        ],
        compiler_params=pltpu.CompilerParams(
            dimension_semantics=("arbitrary",),
            vmem_limit_bytes=vmem_limit,
        ),
    )(x, wt, noise)

    # ---- pass 2: emit sweep (independent blocks -> parallel / v7x megacore) ------------
    cw2d, disp2d = pl.pallas_call(
        _top2gate_emit_kernel,
        out_shape=(
            jax.ShapeDtypeStruct((S, EC), combine_dtype),
            jax.ShapeDtypeStruct((S, EC), jnp.int8),
        ),
        grid=(NB,),
        in_specs=[
            pl.BlockSpec((TS, 8), lambda i: (i, 0)),
            pl.BlockSpec((1, E), lambda i: (0, 0)),
        ],
        out_specs=(
            pl.BlockSpec((TS, EC), lambda i: (i, 0)),
            pl.BlockSpec((TS, EC), lambda i: (i, 0)),
        ),
        compiler_params=pltpu.CompilerParams(
            dimension_semantics=("parallel",),
            vmem_limit_bytes=vmem_limit,
        ),
    )(inter, cnt1)

    # l_aux = mean(mean(gates, 0) * mean(mask1, 0)) -- tiny [E] arrays, no extra HBM sweep.
    l_aux = jnp.mean((me[0] / S) * (cnt1[0] / S))

    combine_weights = cw2d.reshape(S, E, C)
    # TODO(synk): emit a bool dispatch mask directly from the kernel once Mosaic i1 stores
    # are dependable; the int8 -> bool cast below is an extra [S,E,C] HBM round trip.
    dispatch_mask = disp2d.reshape(S, E, C).astype(bool)
    return l_aux, combine_weights, dispatch_mask


def _top2gating_ref(logits, noise):
    """Pure-JAX f32 reference of fairscale's top2gating (self-test only)."""
    S, E = logits.shape
    C = 2 * S // E
    gates = jax.nn.softmax(logits, axis=1)
    idx1 = jnp.argmax(gates, axis=1)
    mask1 = jax.nn.one_hot(idx1, E, dtype=jnp.float32)
    logits_ex1 = jnp.where(mask1 > 0, -jnp.inf, logits + noise)
    idx2 = jnp.argmax(logits_ex1, axis=1)
    mask2 = jax.nn.one_hot(idx2, E, dtype=jnp.float32)
    loc1 = jnp.cumsum(mask1, axis=0) - 1.0
    loc2 = jnp.cumsum(mask2, axis=0) - 1.0 + jnp.sum(mask1, axis=0, keepdims=True)
    me = jnp.mean(gates, axis=0)
    ce = jnp.mean(mask1, axis=0)
    l_aux = jnp.mean(me * ce)
    mask1 = mask1 * (loc1 < C)
    mask2 = mask2 * (loc2 < C)
    loc1_s = jnp.sum(loc1 * mask1, axis=1).astype(jnp.int32)
    loc2_s = jnp.sum(loc2 * mask2, axis=1).astype(jnp.int32)
    g1_s = jnp.sum(gates * mask1, axis=1)
    g2_s = jnp.sum(gates * mask2, axis=1)
    denom = jnp.maximum(g1_s + g2_s, jnp.finfo(jnp.float32).eps)
    g1_s = g1_s / denom
    g2_s = g2_s / denom
    combine = (jnp.einsum('se,sc->sec', g1_s[:, None] * mask1,
                          jax.nn.one_hot(loc1_s, C, dtype=jnp.float32))
               + jnp.einsum('se,sc->sec', g2_s[:, None] * mask2,
                            jax.nn.one_hot(loc2_s, C, dtype=jnp.float32)))
    return l_aux, combine, combine > 0


if __name__ == "__main__":
    key = jax.random.PRNGKey(0)
    k_x, k_w, k_n = jax.random.split(key, 3)

    # small shapes implied by the module: tokens=8, model_dim=32, experts=4 -> capacity=4
    S, M, E = 8, 32, 4

    x = jax.random.normal(k_x, (S, M), dtype=jnp.float32)

    # deterministic init of nn.Linear(model_dim, num_experts, bias=False).weight  [E, M]
    bound = 1.0 / (M ** 0.5)
    wg_weight = jax.random.uniform(k_w, (E, M), minval=-bound, maxval=bound,
                                   dtype=jnp.float32)

    # Gumbel(0,1) noise used for the second-expert selection (torch gumbel_rsample).
    gumbel_noise = jax.random.gumbel(k_n, (S, E), dtype=jnp.float32)

    l_aux, combine_weights, dispatch_mask = top2gate(x, wg_weight, gumbel_noise)
    jax.block_until_ready((l_aux, combine_weights, dispatch_mask))

    C = 2 * S // E
    assert combine_weights.shape == (S, E, C)
    assert dispatch_mask.shape == (S, E, C) and dispatch_mask.dtype == jnp.bool_
    assert bool(jnp.isfinite(l_aux))

    # Cross-check against a pure-JAX f32 reference fed the same bf16-rounded logits.
    logits_ref = jnp.dot(x.astype(jnp.bfloat16), wg_weight.astype(jnp.bfloat16).T,
                         preferred_element_type=jnp.float32)
    l_ref, cw_ref, disp_ref = _top2gating_ref(logits_ref, gumbel_noise)
    assert bool(jnp.all(dispatch_mask == disp_ref))
    assert bool(jnp.allclose(combine_weights.astype(jnp.float32), cw_ref, atol=2e-2))
    assert bool(jnp.allclose(l_aux, l_ref, rtol=1e-3, atol=1e-6))
    print("KERNEL_OK")
</pallas_src>

<mosaic_0001>
module attributes {stable_mosaic.version = 11 : i64} {
  func.func @_top2gate_stats_kernel(%arg0: i32, %arg1: memref<8x32xf32, #tpu.memory_space<vmem>>, %arg2: memref<32x4xbf16, #tpu.memory_space<vmem>>, %arg3: memref<8x4xf32, #tpu.memory_space<vmem>>, %arg4: memref<8x8xf32, #tpu.memory_space<vmem>>, %arg5: memref<1x4xf32, #tpu.memory_space<vmem>>, %arg6: memref<1x4xf32, #tpu.memory_space<vmem>>, %arg7: memref<1x4xf32, #tpu.memory_space<vmem>>, %arg8: memref<8x8xbf16, #tpu.memory_space<vmem>>) attributes {dimension_semantics = [#tpu.dimension_semantics<arbitrary>], iteration_bounds = array<i64: 1>, scalar_prefetch = 0 : i64, scratch_operands = 2 : i64, tpu.core_type = #tpu.core_type<tc>, window_params = [{transform_indices = @transform_0, window_bounds = array<i64: 8, 32>}, {pipeline_mode = #tpu.pipeline_mode<synchronous>, transform_indices = @transform_1, window_bounds = array<i64: 32, 4>}, {transform_indices = @transform_2, window_bounds = array<i64: 8, 4>}, {transform_indices = @transform_3, window_bounds = array<i64: 8, 8>}, {pipeline_mode = #tpu.pipeline_mode<synchronous>, transform_indices = @transform_4, window_bounds = array<i64: 1, 4>}, {pipeline_mode = #tpu.pipeline_mode<synchronous>, transform_indices = @transform_5, window_bounds = array<i64: 1, 4>}]} {
    %c0_i32 = arith.constant 0 : i32
    %0 = arith.cmpi eq, %arg0, %c0_i32 : i32
    %1 = arith.extui %0 : i1 to i32
    %c0_i32_0 = arith.constant 0 : i32
    %2 = arith.cmpi ne, %1, %c0_i32_0 : i32
    scf.if %2 {
      %cst_38 = arith.constant 0.000000e+00 : f32
      %87 = vector.broadcast %cst_38 : f32 to vector<1x4xf32>
      %c0_39 = arith.constant 0 : index
      %c0_40 = arith.constant 0 : index
      %88 = vector.load %arg5[%c0_39, %c0_40] : memref<1x4xf32, #tpu.memory_space<vmem>>, vector<1x4xf32>
      tpu.vector_store %arg5[%c0_39, %c0_40], %87 {strides = array<i32>} : memref<1x4xf32, #tpu.memory_space<vmem>>, vector<1x4xf32>,
      %cst_41 = arith.constant 0.000000e+00 : f32
      %89 = vector.broadcast %cst_41 : f32 to vector<1x4xf32>
      %c0_42 = arith.constant 0 : index
      %c0_43 = arith.constant 0 : index
      %90 = vector.load %arg7[%c0_42, %c0_43] : memref<1x4xf32, #tpu.memory_space<vmem>>, vector<1x4xf32>
      tpu.vector_store %arg7[%c0_42, %c0_43], %89 {strides = array<i32>} : memref<1x4xf32, #tpu.memory_space<vmem>>, vector<1x4xf32>,
      %cst_44 = arith.constant 0.000000e+00 : f32
      %91 = vector.broadcast %cst_44 : f32 to vector<1x4xf32>
      %c0_45 = arith.constant 0 : index
      %c0_46 = arith.constant 0 : index
      %92 = vector.load %arg6[%c0_45, %c0_46] : memref<1x4xf32, #tpu.memory_space<vmem>>, vector<1x4xf32>
      tpu.vector_store %arg6[%c0_45, %c0_46], %91 {strides = array<i32>} : memref<1x4xf32, #tpu.memory_space<vmem>>, vector<1x4xf32>,
      %93 = tpu.iota {dimensions = array<i32: 0>} : vector<8x8xi32>
      %94 = tpu.iota {dimensions = array<i32: 1>} : vector<8x8xi32>
      %95 = arith.cmpi sle, %94, %93 : vector<8x8xi32>
      %96 = arith.extui %95 : vector<8x8xi1> to vector<8x8xi32>
      %97 = arith.sitofp %96 : vector<8x8xi32> to vector<8x8xf32>
      %98 = arith.truncf %97 : vector<8x8xf32> to vector<8x8xbf16>
      %c0_47 = arith.constant 0 : index
      %c0_48 = arith.constant 0 : index
      %99 = vector.load %arg8[%c0_47, %c0_48] : memref<8x8xbf16, #tpu.memory_space<vmem>>, vector<8x8xbf16>
      tpu.vector_store %arg8[%c0_47, %c0_48], %98 {strides = array<i32>} : memref<8x8xbf16, #tpu.memory_space<vmem>>, vector<8x8xbf16>,
    } else {
    }
    %c0 = arith.constant 0 : index
    %c0_1 = arith.constant 0 : index
    %3 = vector.load %arg1[%c0, %c0_1] : memref<8x32xf32, #tpu.memory_space<vmem>>, vector<8x32xf32>
    %4 = arith.truncf %3 : vector<8x32xf32> to vector<8x32xbf16>
    %c0_2 = arith.constant 0 : index
    %c0_3 = arith.constant 0 : index
    %5 = vector.load %arg2[%c0_2, %c0_3] : memref<32x4xbf16, #tpu.memory_space<vmem>>, vector<32x4xbf16>
    %cst = arith.constant dense<0.000000e+00> : vector<8x4xf32>
    %6 = tpu.matmul %4, %5, %cst {dimension_numbers = #tpu.dot_dimension_numbers<[1], [0], [0], [1], [0, 0, 1, 1], [], []>} : vector<8x32xbf16>, vector<32x4xbf16>, vector<8x4xf32> -> vector<8x4xf32>
    %cst_4 = arith.constant dense<0xFF800000> : vector<8xf32>
    %7 = vector.multi_reduction <maximumf>, %6, %cst_4 [1] : vector<8x4xf32> to vector<8xf32>
    %8 = vector.shape_cast %7 : vector<8xf32> to vector<8x1xf32>
    %9 = vector.broadcast %8 : vector<8x1xf32> to vector<8x4xf32>
    %10 = arith.subf %6, %9 : vector<8x4xf32>
    %11 = math.exp %10 : vector<8x4xf32>
    %cst_5 = arith.constant dense<0.000000e+00> : vector<8xf32>
    %12 = vector.multi_reduction <add>, %11, %cst_5 [1] : vector<8x4xf32> to vector<8xf32>
    %13 = vector.shape_cast %12 : vector<8xf32> to vector<8x1xf32>
    %14 = vector.broadcast %13 : vector<8x1xf32> to vector<8x4xf32>
    %15 = arith.divf %11, %14 : vector<8x4xf32>
    %16 = tpu.iota {dimensions = array<i32: 1>} : vector<8x4xi32>
    %17 = vector.broadcast %8 : vector<8x1xf32> to vector<8x4xf32>
    %18 = arith.cmpf oeq, %6, %17 : vector<8x4xf32>
    %c4_i32 = arith.constant 4 : i32
    %19 = vector.broadcast %c4_i32 : i32 to vector<8x4xi32>
    %20 = arith.select %18, %16, %19 : vector<8x4xi1>, vector<8x4xi32>
    %cst_6 = arith.constant dense<2147483647> : vector<8xi32>
    %21 = vector.multi_reduction <minsi>, %20, %cst_6 [1] : vector<8x4xi32> to vector<8xi32>
    %22 = vector.shape_cast %21 : vector<8xi32> to vector<8x1xi32>
    %23 = vector.broadcast %22 : vector<8x1xi32> to vector<8x4xi32>
    %24 = arith.cmpi eq, %16, %23 : vector<8x4xi32>
    %c0_7 = arith.constant 0 : index
    %c0_8 = arith.constant 0 : index
    %25 = vector.load %arg3[%c0_7, %c0_8] : memref<8x4xf32, #tpu.memory_space<vmem>>, vector<8x4xf32>
    %26 = arith.addf %6, %25 : vector<8x4xf32>
    %cst_9 = arith.constant 0xFF800000 : f32
    %27 = vector.broadcast %cst_9 : f32 to vector<8x4xf32>
    %28 = arith.select %24, %27, %26 : vector<8x4xi1>, vector<8x4xf32>
    %cst_10 = arith.constant dense<0xFF800000> : vector<8xf32>
    %29 = vector.multi_reduction <maximumf>, %28, %cst_10 [1] : vector<8x4xf32> to vector<8xf32>
    %30 = vector.shape_cast %29 : vector<8xf32> to vector<8x1xf32>
    %31 = vector.broadcast %30 : vector<8x1xf32> to vector<8x4xf32>
    %32 = arith.cmpf oeq, %28, %31 : vector<8x4xf32>
    %c4_i32_11 = arith.constant 4 : i32
    %33 = vector.broadcast %c4_i32_11 : i32 to vector<8x4xi32>
    %34 = arith.select %32, %16, %33 : vector<8x4xi1>, vector<8x4xi32>
    %cst_12 = arith.constant dense<2147483647> : vector<8xi32>
    %35 = vector.multi_reduction <minsi>, %34, %cst_12 [1] : vector<8x4xi32> to vector<8xi32>
    %36 = vector.shape_cast %35 : vector<8xi32> to vector<8x1xi32>
    %37 = vector.broadcast %36 : vector<8x1xi32> to vector<8x4xi32>
    %38 = arith.cmpi eq, %16, %37 : vector<8x4xi32>
    %39 = arith.extui %24 : vector<8x4xi1> to vector<8x4xi32>
    %40 = arith.sitofp %39 : vector<8x4xi32> to vector<8x4xf32>
    %41 = arith.extui %38 : vector<8x4xi1> to vector<8x4xi32>
    %42 = arith.sitofp %41 : vector<8x4xi32> to vector<8x4xf32>
    %43 = tpu.concatenate %40, %42 in 1 : vector<8x4xf32>, vector<8x4xf32> -> vector<8x8xf32>
    %44 = arith.truncf %43 : vector<8x8xf32> to vector<8x8xbf16>
    %c0_13 = arith.constant 0 : index
    %c0_14 = arith.constant 0 : index
    %45 = vector.load %arg8[%c0_13, %c0_14] : memref<8x8xbf16, #tpu.memory_space<vmem>>, vector<8x8xbf16>
    %cst_15 = arith.constant dense<0.000000e+00> : vector<8x8xf32>
    %46 = tpu.matmul %45, %44, %cst_15 {dimension_numbers = #tpu.dot_dimension_numbers<[1], [0], [0], [1], [0, 0, 1, 1], [], []>} : vector<8x8xbf16>, vector<8x8xbf16>, vector<8x8xf32> -> vector<8x8xf32>
    %c0_16 = arith.constant 0 : index
    %c0_17 = arith.constant 0 : index
    %47 = vector.load %arg5[%c0_16, %c0_17] : memref<1x4xf32, #tpu.memory_space<vmem>>, vector<1x4xf32>
    %c0_18 = arith.constant 0 : index
    %c0_19 = arith.constant 0 : index
    %48 = vector.load %arg7[%c0_18, %c0_19] : memref<1x4xf32, #tpu.memory_space<vmem>>, vector<1x4xf32>
    %49 = vector.extract_strided_slice %46 {offsets = [0, 0], sizes = [8, 4], strides = [1, 1]} : vector<8x8xf32> to vector<8x4xf32>
    %cst_20 = arith.constant 1.000000e+00 : f32
    %50 = vector.broadcast %cst_20 : f32 to vector<8x4xf32>
    %51 = arith.subf %49, %50 : vector<8x4xf32>
    %52 = vector.broadcast %47 : vector<1x4xf32> to vector<8x4xf32>
    %53 = arith.addf %51, %52 : vector<8x4xf32>
    %54 = vector.extract_strided_slice %46 {offsets = [0, 4], sizes = [8, 4], strides = [1, 1]} : vector<8x8xf32> to vector<8x4xf32>
    %cst_21 = arith.constant 1.000000e+00 : f32
    %55 = vector.broadcast %cst_21 : f32 to vector<8x4xf32>
    %56 = arith.subf %54, %55 : vector<8x4xf32>
    %57 = vector.broadcast %48 : vector<1x4xf32> to vector<8x4xf32>
    %58 = arith.addf %56, %57 : vector<8x4xf32>
    %59 = vector.extract_strided_slice %46 {offsets = [7, 0], sizes = [1, 4], strides = [1, 1]} : vector<8x8xf32> to vector<1x4xf32>
    %60 = arith.addf %47, %59 : vector<1x4xf32>
    %c0_22 = arith.constant 0 : index
    %c0_23 = arith.constant 0 : index
    %61 = vector.load %arg5[%c0_22, %c0_23] : memref<1x4xf32, #tpu.memory_space<vmem>>, vector<1x4xf32>
    tpu.vector_store %arg5[%c0_22, %c0_23], %60 {strides = array<i32>} : memref<1x4xf32, #tpu.memory_space<vmem>>, vector<1x4xf32>,
    %62 = vector.extract_strided_slice %46 {offsets = [7, 4], sizes = [1, 4], strides = [1, 1]} : vector<8x8xf32> to vector<1x4xf32>
    %63 = arith.addf %48, %62 : vector<1x4xf32>
    %c0_24 = arith.constant 0 : index
    %c0_25 = arith.constant 0 : index
    %64 = vector.load %arg7[%c0_24, %c0_25] : memref<1x4xf32, #tpu.memory_space<vmem>>, vector<1x4xf32>
    tpu.vector_store %arg7[%c0_24, %c0_25], %63 {strides = array<i32>} : memref<1x4xf32, #tpu.memory_space<vmem>>, vector<1x4xf32>,
    %c0_26 = arith.constant 0 : index
    %c0_27 = arith.constant 0 : index
    %65 = vector.load %arg6[%c0_26, %c0_27] : memref<1x4xf32, #tpu.memory_space<vmem>>, vector<1x4xf32>
    %cst_28 = arith.constant dense<0.000000e+00> : vector<4xf32>
    %66 = vector.multi_reduction <add>, %15, %cst_28 [0] : vector<8x4xf32> to vector<4xf32>
    %67 = vector.shape_cast %66 : vector<4xf32> to vector<1x4xf32>
    %68 = arith.addf %65, %67 : vector<1x4xf32>
    %c0_29 = arith.constant 0 : index
    %c0_30 = arith.constant 0 : index
    %69 = vector.load %arg6[%c0_29, %c0_30] : memref<1x4xf32, #tpu.memory_space<vmem>>, vector<1x4xf32>
    tpu.vector_store %arg6[%c0_29, %c0_30], %68 {strides = array<i32>} : memref<1x4xf32, #tpu.memory_space<vmem>>, vector<1x4xf32>,
    %70 = arith.mulf %15, %40 : vector<8x4xf32>
    %cst_31 = arith.constant dense<0.000000e+00> : vector<8xf32>
    %71 = vector.multi_reduction <add>, %70, %cst_31 [1] : vector<8x4xf32> to vector<8xf32>
    %72 = vector.shape_cast %71 : vector<8xf32> to vector<8x1xf32>
    %73 = arith.mulf %15, %42 : vector<8x4xf32>
    %cst_32 = arith.constant dense<0.000000e+00> : vector<8xf32>
    %74 = vector.multi_reduction <add>, %73, %cst_32 [1] : vector<8x4xf32> to vector<8xf32>
    %75 = vector.shape_cast %74 : vector<8xf32> to vector<8x1xf32>
    %76 = arith.mulf %53, %40 : vector<8x4xf32>
    %cst_33 = arith.constant dense<0.000000e+00> : vector<8xf32>
    %77 = vector.multi_reduction <add>, %76, %cst_33 [1] : vector<8x4xf32> to vector<8xf32>
    %78 = vector.shape_cast %77 : vector<8xf32> to vector<8x1xf32>
    %79 = arith.mulf %58, %42 : vector<8x4xf32>
    %cst_34 = arith.constant dense<0.000000e+00> : vector<8xf32>
    %80 = vector.multi_reduction <add>, %79, %cst_34 [1] : vector<8x4xf32> to vector<8xf32>
    %81 = vector.shape_cast %80 : vector<8xf32> to vector<8x1xf32>
    %82 = arith.sitofp %22 : vector<8x1xi32> to vector<8x1xf32>
    %83 = arith.sitofp %36 : vector<8x1xi32> to vector<8x1xf32>
    %cst_35 = arith.constant 0.000000e+00 : f32
    %84 = vector.broadcast %cst_35 : f32 to vector<8x2xf32>
    %85 = tpu.concatenate %82, %83, %72, %75, %78, %81, %84 in 1 : vector<8x1xf32>, vector<8x1xf32>, vector<8x1xf32>, vector<8x1xf32>, vector<8x1xf32>, vector<8x1xf32>, vector<8x2xf32> -> vector<8x8xf32>
    %c0_36 = arith.constant 0 : index
    %c0_37 = arith.constant 0 : index
    %86 = vector.load %arg4[%c0_36, %c0_37] : memref<8x8xf32, #tpu.memory_space<vmem>>, vector<8x8xf32>
    tpu.vector_store %arg4[%c0_36, %c0_37], %85 {strides = array<i32>} : memref<8x8xf32, #tpu.memory_space<vmem>>, vector<8x8xf32>,
    return
  }
  func.func @transform_0(%arg0: i32) -> (i32, i32) {
    %c0_i32 = arith.constant 0 : i32
    %c0_i32_0 = arith.constant 0 : i32
    return %arg0, %c0_i32 : i32, i32
  }
  func.func @transform_1(%arg0: i32) -> (i32, i32) {
    %c0_i32 = arith.constant 0 : i32
    %c0_i32_0 = arith.constant 0 : i32
    %c0_i32_1 = arith.constant 0 : i32
    return %c0_i32, %c0_i32_0 : i32, i32
  }
  func.func @transform_2(%arg0: i32) -> (i32, i32) {
    %c0_i32 = arith.constant 0 : i32
    %c0_i32_0 = arith.constant 0 : i32
    return %arg0, %c0_i32 : i32, i32
  }
  func.func @transform_3(%arg0: i32) -> (i32, i32) {
    %c0_i32 = arith.constant 0 : i32
    %c0_i32_0 = arith.constant 0 : i32
    return %arg0, %c0_i32 : i32, i32
  }
  func.func @transform_4(%arg0: i32) -> (i32, i32) {
    %c0_i32 = arith.constant 0 : i32
    %c0_i32_0 = arith.constant 0 : i32
    %c0_i32_1 = arith.constant 0 : i32
    return %c0_i32, %c0_i32_0 : i32, i32
  }
  func.func @transform_5(%arg0: i32) -> (i32, i32) {
    %c0_i32 = arith.constant 0 : i32
    %c0_i32_0 = arith.constant 0 : i32
    %c0_i32_1 = arith.constant 0 : i32
    return %c0_i32, %c0_i32_0 : i32, i32
  }
}

</mosaic_0001>

<bundles_post_ra>
// kernel: tpu_custom_call.1
= control target key start
LH: loop header
LB: loop body
LE: loop exit
PB: predicated region body
PF: predicated region fallthrough
CT: control target
= control target key end

     0   :  { %11 = vsyncpa [#allocation5], 0  ;;  %v457_v1 = vmov 0.0   ;;  %vm458_vm0 = vmmov 0   ;;  %s607_s0 = inlined_call_operand.vmem [shape: f32[8,32], index: 0, kind: input, shape index: {}]   ;;  %s608_s1 = inlined_call_operand.vmem [shape: bf16[32,4], index: 1, kind: input, shape index: {}]   ;;  %s609_s2 = inlined_call_operand.vmem [shape: f32[8,4], index: 2, kind: input, shape index: {}]   ;;  %s610_s3 = inlined_call_operand.hbm [shape: f32[8,8], index: 3, kind: output, shape index: {0}]   ;;  %s611_s4 = inlined_call_operand.hbm [shape: f32[1,4], index: 4, kind: output, shape index: {1}]   ;;  %s612_s5 = inlined_call_operand.hbm [shape: f32[1,4], index: 5, kind: output, shape index: {2}]  }
   0x1   :  { %v381_v0 = vld [vmem:[%s608_s1] sm:$0xff]   ;;  %359 = vmatprep.subr.bf16.mxu0 %v457_v1  ;;  %367 = vmatprep.subr.bf16.mxu1 %v457_v1  ;;  %v382_v2 = vld [vmem:[%s608_s1 + $0x8] sm:$0xff]  }
   0x2   :  { %360 = vmatpush3.bf16.msra.mxu0 %v381_v0  ;;  %363 = vmatprep.mubr.msk.bf16.mxu0 %vm458_vm0, %v457_v1  ;;  %v38_v3 = vld [vmem:[%s607_s0] sm:$0xff] }
   0x3   :  { %12 = vsyncpa [#allocation7], 0  ;;  %361 = vmatprep.subr.bf16.mxu0 %v457_v1  ;;  %369 = vmatprep.mubr.msk.bf16.mxu1 %vm458_vm0, %v457_v1  ;;  %v39_v4 = vpack.c.bf16 %v38_v3, %v38_v3  ;;  %vm56_vm1 = vcmask 261120   ;;  %vm100_vm2 = vcmask 31744   ;;  %v28_v10 = vlaneseq  ;;  %v132_v25 = vld [vmem:[%s609_s2] sm:$0xff]  ;;  %s459_s2 = smov 4  }
   0x4   :  { %vm24_vm7 = vcmask 24576   ;;  %vm36_vm9 = vcmask 60416   ;;  %vm293_vm11 = vcmask 7168   ;;  %vm171_vm13 = vcmask 1043456   ;;  %s461_s24 = smov 124   ;;  %s462_s25 = smov [#allocation6]  }
   0x5   :  { %v510_v11 = vand.u32 127, %v28_v10  ;;  %v527_v35 = vshrl.u32 %v28_v10, 7  ;;  %26 = vst.msk [vmem:[#allocation2] sm:$0x1] %vm24_vm7, %v457_v1  ;;  %25 = vst.msk [vmem:[#allocation6] sm:$0x1] %vm24_vm7, %v457_v1 }
   0x6   :  { %362 = vmatpush3.bf16.msra.mxu0 %v382_v2  ;;  %27 = vst.msk [vmem:[#allocation8] sm:$0x1] %vm24_vm7, %v457_v1  ;;  %vm167_vm14 = vcmask 64512   ;;  %s321_s26 = sshll.u32 %s462_s25, 4  ;;  %s322_s26 = int_to_ptr.vmem [resolvable:$true] %s321_s26 }
   0x7   :  { %vm32_vm8 = vcmp.le.s32.totalorder %v510_v11, %v527_v35  ;;  %v221_v42 = vsub.s32 0, %v527_v35  ;;  %s387_s27 = scalar_lea.vmem %s322_s26, 16  ;;  %s391_s28 = scalar_lea.vmem %s322_s26, 32 }
   0x8   :  { %v346_v36 = vsel %vm32_vm8, 1.0, %v457_v1  ;;  %p388_p0 = scmp.ne.s32.totalorder %s322_s26, %s387_s27  ;;  %p392_p1 = scmp.lt.s32.totalorder %s322_s26, %s322_s26 }
   0x9   :  { %364 = vmatmul.mubr.msk.bf16.vlgmr.msra.gmra.mrb[0].mxu0 %vm56_vm1, %v39_v4  ;;  %v35_v37 = vpack.c.bf16 %v346_v36, %v346_v36  ;;  %p393_p2 = scmp.lt.s32.totalorder %s391_s28, %s387_s27 }
   0xb   :  { %37 = vst.msk [vmem:[#allocation3] sm:$0xf] %vm36_vm9, %v35_v37  ;;  %p394_p3 = por %p393_p2, %p392_p1 }
   0xc   :  { %v539_v43 = vld [vmem:[#allocation2] sm:$0x1] }
   0xd   :  { %v229_v44 = vrot.slane %v539_v43, %v221_v42  ;;  %p395_p4 = pnand %p394_p3, %p388_p0 }
  0xdc   :  { %v94_v5 = vpop.f32.mrb[0].mxu0 }
  0xdd   :  { %v365_v6 = vpop.f32.mrb[1].mxu0  ;;  %v101_v7 = vsel %vm100_vm2, %v94_v5, -inf  ;;  %v133_v27 = vadd.f32 %v132_v25, %v94_v5 }
  0xde   :  { %102 = vmax.xlane.f32.xlu0 %v101_v7  ;;  %v97_v8 = vpop.f32.mrb[2].mxu0  ;;  %v261_v7 = vld [vmem:[#allocation8] sm:$0x1] }
  0xdf   :  { %v366_v9 = vpop.f32.mrb[3].mxu0 }
 0x16b   :  { %v103_v12 = vpop.xlane.xlu0 %102 }
 0x16c   :  { %vm114_vm3 = vcmp.eq.f32.partialorder %v94_v5, %v103_v12  ;;  %v104_v45 = vsub.f32 %v94_v5, %v103_v12 }
 0x16d   :  { %v115_v13 = vsel %vm114_vm3, %v510_v11, 4 }
 0x16e   :  { %v116_v14 = vsel %vm100_vm2, %v115_v13, 2147483647  ;;  %v105_v46 = vmul.f32 1.442695, %v104_v45 }
 0x16f   :  { %v118_v15 = vshra.s32 %v116_v14, 16  ;;  %v117_v17 = vand.u32 65535, %v116_v14 }
 0x170   :  { %383 = vpow2.f32 %v105_v46 }
 0x171   :  { %v120_v16 = vcvt.s32.f32 %v118_v15  ;;  %v119_v19 = vcvt.s32.f32 %v117_v17  ;;  %v460_v17 = vmov 1966171168  }
 0x173   :  { %121 = vmin.xlane.f32.xlu0 %v120_v16 }
 0x17a   :  { %v384_v47 = vpop.eup %383 }
 0x17b   :  { %v107_v48 = vsel %vm100_vm2, %v384_v47, 0.0 }
 0x200   :  { %v122_v18 = vpop.xlane.xlu0 %121 }
 0x201   :  { %vm123_vm4 = vcmp.eq.f32.partialorder %v120_v16, %v122_v18  ;;  %v128_v21 = vcvt.f32.s32 %v122_v18  ;;  %v166_v16 = vld [vmem:[#allocation3] sm:$0xf]  ;;  %v237_v18 = vunpack.c.l.s4 %v460_v17 }
 0x202   :  { %v124_v20 = vsel %vm123_vm4, %v119_v19, inf }
 0x203   :  { %125 = vmin.xlane.f32.xlu1 %v124_v20  ;;  %v129_v23 = vshll.u32 %v128_v21, 16  ;;  %v238_v19 = vunpack.c.0.s8 %v237_v18 }
 0x205   :  { %v241_v20 = vsub.s32 %v238_v19, %v527_v35 }
 0x290   :  { %v126_v22 = vpop.xlane.xlu1 %125 }
 0x291   :  { %v127_v24 = vcvt.f32.s32 %v126_v22 }
 0x293   :  { %v517_v26 = vadd.s32 %v129_v23, %v127_v24 }
 0x295   :  { %vm131_vm5 = vcmp.eq.s32.totalorder %v510_v11, %v517_v26  ;;  %v291_v54 = vcvt.s32.f32 %v517_v26 }
 0x296   :  { %v134_v28 = vsel %vm131_vm5, -inf, %v133_v27  ;;  %v350_v10 = vsel %vm131_vm5, 1.0, %v457_v1 }
 0x297   :  { %v135_v29 = vsel %vm100_vm2, %v134_v28, -inf }
 0x298   :  { %136 = vmax.xlane.f32.xlu1 %v135_v29 }
 0x325   :  { %v137_v30 = vpop.xlane.xlu1 %136 }
 0x326   :  { %vm138_vm6 = vcmp.eq.f32.partialorder %v134_v28, %v137_v30 }
 0x327   :  { %v139_v31 = vsel %vm138_vm6, %v510_v11, 4 }
 0x328   :  { %v140_v32 = vsel %vm100_vm2, %v139_v31, 2147483647  ;;  %v215_v31 = vld [vmem:[#allocation6] sm:$0x1] }
 0x329   :  { %v142_v33 = vshra.s32 %v140_v32, 16  ;;  %v141_v38 = vand.u32 65535, %v140_v32 }
 0x32b   :  { %v144_v34 = vcvt.s32.f32 %v142_v33  ;;  %v143_v40 = vcvt.s32.f32 %v141_v38  ;;  %v222_v33 = vrot.slane %v215_v31, %v221_v42 }
 0x32d   :  { %145 = vmin.xlane.f32.xlu0 %v144_v34 }
 0x3ba   :  { %v146_v39 = vpop.xlane.xlu0 %145 }
 0x3bb   :  { %vm147_vm10 = vcmp.eq.f32.partialorder %v144_v34, %v146_v39  ;;  %v152_v49 = vcvt.f32.s32 %v146_v39 }
 0x3bc   :  { %v148_v41 = vsel %vm147_vm10, %v143_v40, inf }
 0x3bd   :  { %149 = vmin.xlane.f32.xlu1 %v148_v41  ;;  %v153_v51 = vshll.u32 %v152_v49, 16 }
 0x3ce   :  { %230 = vrot.lane.b32.xlu1 %v229_v44, %s459_s2 }
 0x3f2   :  { %108 = vadd.xlane.f32.xlu1 %v107_v48 }
 0x44a   :  { %v150_v50 = vpop.xlane.xlu1 %149 }
 0x44b   :  { %v151_v52 = vcvt.f32.s32 %v150_v50 }
 0x44d   :  { %v154_v53 = vadd.s32 %v153_v51, %v151_v52 }
 0x44e   :  { %v231_v58 = vpop.permute.xlu1 %230 }
 0x44f   :  { %v292_v55 = vcvt.s32.f32 %v154_v53  ;;  %vm155_vm12 = vcmp.eq.s32.totalorder %v510_v11, %v154_v53 }
 0x450   :  { %v351_v56 = vsel %vm155_vm12, 1.0, %v457_v1 }
 0x451   :  { %161 = vrot.lane.b32.xlu0 %v351_v56, %s459_s2  ;;  %v548_v57 = vsel %vm293_vm11, %v291_v54, %v292_v55 }
 0x47f   :  { %v109_v59 = vpop.xlane.xlu1 %108 }
 0x480   :  { %385 = vrcp.f32 %v109_v59 }
 0x48a   :  { %v386_v60 = vpop.eup %385 }
 0x48b   :  { %v111_v61 = vmul.f32 %v386_v60, %v384_v47 }
 0x48d   :  { %v275_v62 = vmul.f32 %v351_v56, %v111_v61  ;;  %v262_v63 = vsel %vm100_vm2, %v111_v61, 0.0  ;;  %v271_v36 = vmul.f32 %v350_v10, %v111_v61 }
 0x48e   :  { %v263_v0 = vrot.slane %v262_v63, 4 }
 0x48f   :  { %v276_v2 = vsel %vm100_vm2, %v275_v62, 0.0  ;;  %v272_v37 = vsel %vm100_vm2, %v271_v36, 0.0 }
 0x490   :  { %277 = vadd.xlane.f32.xlu1 %v276_v2  ;;  %v264_v3 = vadd.f32 %v263_v0, %v262_v63 }
 0x492   :  { %v265_v4 = vrot.slane %v264_v3, 2 }
 0x494   :  { %v266_v5 = vadd.f32 %v265_v4, %v264_v3 }
 0x496   :  { %v267_v6 = vrot.slane %v266_v5, 1 }
 0x498   :  { %v268_v8 = vadd.f32 %v267_v6, %v266_v5 }
 0x49a   :  { %v269_v9 = vadd.f32 %v268_v8, %v261_v7 }
 0x49c   :  { %270 = vst.msk [vmem:[#allocation8] sm:$0x1] %vm24_vm7, %v269_v9 }
 0x4c3   :  { %v162_v12 = vpop.permute.xlu0 %161 }
 0x4c4   :  { %v164_v13 = vsel %vm100_vm2, %v350_v10, %v162_v12 }
 0x4c5   :  { %v165_v14 = vpack.c.bf16 %v164_v13, %v164_v13 }
 0x4c7   :  { %v173_v15 = vsel %vm171_vm13, %v165_v14, 0 }
 0x4c8   :  { %368 = vmatpush3.bf16.msra.mxu1 %v173_v15 }
 0x4cb   :  { %370 = vmatmul.mubr.msk.bf16.vlgmr.msra.gmra.mrb[0].mxu1 %vm167_vm14, %v166_v16 }
 0x59e   :  { %v209_v21 = vpop.f32.mrb[0].mxu1 }
 0x59f   :  { %v353_v22 = vadd.f32 -1.0, %v209_v21  ;;  %v235_v11 = vcombine.high %v209_v21, %v209_v21  ;;  %v371_v1 = vpop.f32.mrb[1].mxu1 }
 0x5a0   :  { %v212_v23 = vpop.f32.mrb[2].mxu1 }
 0x5a1   :  { %v233_v24 = vadd.f32 %v353_v22, %v231_v58  ;;  %v242_v25 = vrot.slane %v235_v11, %v241_v20  ;;  %v372_v26 = vpop.f32.mrb[3].mxu1  ;;  %v224_v34 = vadd.f32 %v353_v22, %v222_v33 }
 0x5a3   :  { %v243_v27 = vcombine.high %v242_v25, %v242_v25  ;;  %v283_v28 = vmul.f32 %v233_v24, %v162_v12  ;;  %v279_v38 = vmul.f32 %v350_v10, %v224_v34 }
 0x5a5   :  { %285 = vrot.lane.b32.xlu0 %v283_v28, %s461_s24  ;;  %v250_v29 = vrot.slane %v243_v27, %v241_v20  ;;  %v280_v39 = vsel %vm100_vm2, %v279_v38, 0.0 }
 0x5a7   :  { %v251_v30 = vcombine.high %v250_v29, %v250_v29 }
 0x5a9   :  { %v253_v32 = vadd.f32 %v251_v30, %v215_v31 }
 0x5ab   :  { %255 = vst.msk [vmem:[#allocation6] sm:$0x1] %vm24_vm7, %v253_v32 }
 0x5c4   :  { %273 = vadd.xlane.f32.xlu0 %v272_v37 }
 0x5c8   :  { %281 = vadd.xlane.f32.xlu0 %v280_v39 }
 0x5de   :  { %256 = vrot.lane.b32.xlu0 %v251_v30, %s461_s24 }
 0x617   :  { %v286_v40 = vpop.permute.xlu0 %285 }
 0x618   :  { %v288_v41 = vsel %vm100_vm2, %v286_v40, 0.0 }
 0x619   :  { %289 = vadd.xlane.f32.xlu1 %v288_v41 }
 0x61a   :  { %398 = shalt.err (!%p395_p4)
}
 0x61b   :  { %s399_s6 = scalar_lea.hbm %s611_s4, 16 }
 0x61c   :  { %p400_p5 = scmp.ne.s32.totalorder %s611_s4, %s399_s6  ;;  %p403_p6 = scmp.lt.u32.totalorder %s399_s6, %s611_s4 }
 0x61e   :  { %p405_p7 = pnand %p403_p6, %p400_p5 }
 0x620   :  { %408 = shalt.err (!%p405_p7)
}
 0x621   :  { %324 = dma.vmem_to_hbm [thread:$0]  %s322_s26, 16, %s611_s4, [#allocation7]  }
 0x622   :  { %s463_s13 = smov [#allocation8]  }
 0x623   :  { %s331_s14 = sshll.u32 %s463_s13, 4  ;;  %s332_s14 = int_to_ptr.vmem [resolvable:$true] %s331_s14 }
 0x624   :  { %s409_s15 = scalar_lea.vmem %s332_s14, 16  ;;  %s413_s16 = scalar_lea.vmem %s332_s14, 32 }
 0x625   :  { %p410_p8 = scmp.ne.s32.totalorder %s332_s14, %s409_s15  ;;  %p414_p9 = scmp.lt.s32.totalorder %s332_s14, %s332_s14 }
 0x626   :  { %p415_p10 = scmp.lt.s32.totalorder %s413_s16, %s409_s15 }
 0x628   :  { %p416_p11 = por %p415_p10, %p414_p9 }
 0x62a   :  { %p417_p12 = pnand %p416_p11, %p410_p8 }
 0x62c   :  { %420 = shalt.err (!%p417_p12)
}
 0x62d   :  { %s421_s19 = scalar_lea.hbm %s612_s5, 16 }
 0x62e   :  { %p422_p13 = scmp.ne.s32.totalorder %s612_s5, %s421_s19  ;;  %p425_p0 = scmp.lt.u32.totalorder %s421_s19, %s612_s5 }
 0x630   :  { %p427_p1 = pnand %p425_p0, %p422_p13 }
 0x632   :  { %430 = shalt.err (!%p427_p1)
}
 0x633   :  { %334 = dma.vmem_to_hbm [thread:$0]  %s332_s14, 16, %s612_s5, [#allocation7]   ;;  %vm295_vm15 = vcmask 15360   ;;  %vm297_vm0 = vcmask 23552   ;;  %v278_v44 = vpop.xlane.xlu1 %277  ;;  %vm300_vm1 = vcmask 39936   ;;  %vm302_vm3 = vcmask 48128  }
 0x634   :  { %s464_s1 = smov [#allocation4]  }
 0x635   :  { %s311_s2 = sshll.u32 %s464_s1, 4  ;;  %s312_s2 = int_to_ptr.vmem [resolvable:$true] %s311_s2 }
 0x636   :  { %s431_s5 = scalar_lea.vmem %s312_s2, 128  ;;  %p436_p3 = scmp.lt.s32.totalorder %s312_s2, %s312_s2 }
 0x637   :  { %p432_p2 = scmp.ne.s32.totalorder %s312_s2, %s431_s5  ;;  %p437_p4 = scmp.lt.s32.totalorder %s431_s5, %s431_s5 }
 0x639   :  { %p438_p5 = por %p437_p4, %p436_p3 }
 0x63b   :  { %p439_p6 = pnand %p438_p5, %p432_p2 }
 0x651   :  { %v274_v35 = vpop.xlane.xlu0 %273 }
 0x652   :  { %v296_v42 = vsel %vm295_vm15, %v548_v57, %v274_v35 }
 0x653   :  { %v298_v45 = vsel %vm297_vm0, %v296_v42, %v278_v44 }
 0x655   :  { %v282_v46 = vpop.xlane.xlu0 %281 }
 0x656   :  { %v299_v47 = vsel %vm100_vm2, %v298_v45, %v282_v46 }
 0x659   :  { %v257_v48 = vpop.permute.xlu0 %256 }
 0x65a   :  { %v259_v49 = vadd.f32 %v257_v48, %v539_v43 }
 0x65c   :  { %260 = vst.msk [vmem:[#allocation2] sm:$0x1] %vm24_vm7, %v259_v49 }
 0x6a6   :  { %v290_v50 = vpop.xlane.xlu1 %289 }
 0x6a7   :  { %v301_v51 = vsel %vm300_vm1, %v299_v47, %v290_v50 }
 0x6a8   :  { %v303_v52 = vsel %vm302_vm3, %v301_v51, 0.0 }
 0x6a9   :  { %304 = vst.msk [vmem:[#allocation4] sm:$0xff] %vm167_vm14, %v303_v52 }
 0x6aa   :  { %442 = shalt.err (!%p439_p6)
}
 0x6ab   :  { %s443_s26 = scalar_lea.hbm %s610_s3, 128 }
 0x6ac   :  { %p444_p7 = scmp.ne.s32.totalorder %s610_s3, %s443_s26  ;;  %p447_p8 = scmp.lt.u32.totalorder %s443_s26, %s610_s3 }
 0x6ae   :  { %p449_p9 = pnand %p447_p8, %p444_p7 }
 0x6b0   :  { %452 = shalt.err (!%p449_p9)
}
 0x6b1   :  { %314 = dma.vmem_to_hbm [thread:$0]  %s312_s2, 128, %s610_s3, [#allocation5]  }
 0x6b2   :  { %453 = dma.done.wait [#allocation5], 128  }
 0x6b3   :  { %454 = vsyncadd [#allocation5], 4294967168 }
 0x6b4   :  { %455 = dma.done.wait [#allocation7], 32  }
 0x6b5   :  { %456 = vsyncadd [#allocation7], 4294967264 }
 0x6b6   :  { %344 = vsyncpa [#allocation5], 1 }
 0x6b7   :  { %345 = vsyncpa [#allocation7], 1 }

</bundles_post_ra>
